<compile_context>
chip_gen: v6e
topology: v6e:2x2x1
jax: 0.10.0
libtpu: 0.0.40
codegen_flags: <defaults>
</compile_context>

<pallas_src>
import jax
import jax.numpy as jnp
from jax.experimental import pallas as pl
from jax.experimental.pallas import tpu as pltpu


def _round_up(v, m):
    return (v + m - 1) // m * m


def _cdiv(a, b):
    return (a + b - 1) // b


def _vmem_limit_bytes():
    """Conservative per-call VMEM limit: 75% of physical, capped at 100 MiB."""
    try:
        cap = int(pltpu.get_tpu_info().vmem_capacity_bytes)
    except Exception:
        cap = 64 * 1024 * 1024  # safe fallback for v5e/v6e (128 MiB) and v7x (64 MiB)
    return min(cap * 3 // 4, 100 * 1024 * 1024)


# --------------------------------------------------------------------------- #
# Kernels
# --------------------------------------------------------------------------- #
def _readout_folded_kernel(x_ref, w_ref, b_ref, o_ref):
    # x_ref: (B_tile, N*D_in)  w_ref: (N*D_in, D_out_pad)  b_ref: (1, D_out_pad) f32
    h = jnp.dot(x_ref[...], w_ref[...], preferred_element_type=jnp.float32)
    o_ref[...] = jnp.maximum(h + b_ref[...], 0.0).astype(o_ref.dtype)


def _make_sum_kernel(n_total, n_tile, d_in):
    """General path: node-tiled accumulator kernel (grid = (batch, node))."""
    ragged = (n_total % n_tile) != 0

    def kernel(x_ref, w_ref, b_ref, o_ref, acc_ref):
        k = pl.program_id(1)

        @pl.when(k == 0)
        def _():
            acc_ref[...] = jnp.zeros_like(acc_ref)

        x = x_ref[...]
        if ragged:
            # Mask out-of-range node rows of the last (partial) node block.
            node_ids = (jax.lax.broadcasted_iota(jnp.int32, (1, n_tile, d_in), 1)
                        + k * n_tile)
            x = jnp.where(node_ids < n_total, x, jnp.zeros_like(x))

        xs = jnp.sum(x, axis=1, dtype=jnp.float32)          # f32 node-sum (XLU/VPU)
        acc_ref[...] += jnp.dot(xs.astype(w_ref.dtype), w_ref[...],
                                preferred_element_type=jnp.float32)

        @pl.when(k == pl.num_programs(1) - 1)
        def _():
            o_ref[...] = jnp.maximum(acc_ref[...] + b_ref[...], 0.0
                                     ).astype(o_ref.dtype)

    return kernel


# --------------------------------------------------------------------------- #
# Tile selection
# --------------------------------------------------------------------------- #
def _pick_b_tile(B, row_in_bytes, row_out_bytes, budget):
    cap = _round_up(B, 8)
    if B >= 16:
        # Keep >= 2 parallel grid steps so both v7x TensorCores get work.
        cap = min(cap, _round_up(_cdiv(B, 2), 8))
    cap = min(cap, 512)
    per_row = 2 * row_in_bytes + 2 * row_out_bytes           # double-buffered in + out
    bt = (budget // max(per_row, 1)) // 8 * 8
    return int(max(8, min(cap, bt)))


def _pick_tiles_general(B, N, D_in, D_out_pad, x_bytes, budget):
    d_in_eff = _round_up(D_in, 128)                          # lane-padded footprint

    def cost(bt, nt):
        x_blk = 2 * bt * _round_up(nt, 8) * d_in_eff * x_bytes   # double-buffered x
        o_blk = bt * D_out_pad * (2 * x_bytes + 4)                # out (x2) + f32 acc
        return x_blk + o_blk

    bt = _round_up(B, 8)
    if B >= 16:
        bt = min(bt, _round_up(_cdiv(B, 2), 8))
    bt = min(bt, 256)
    nt = N
    while cost(bt, nt) > budget and nt > 8:                  # shrink node tile first
        nt = max(8, _round_up(_cdiv(nt, 2), 8))
    while cost(bt, nt) > budget and bt > 8:                  # then batch tile
        bt = max(8, (bt // 2) // 8 * 8)
    return bt, nt


# --------------------------------------------------------------------------- #
# Wrapper
# --------------------------------------------------------------------------- #
def readout_forward(x, w, b, *, force_general=False, b_tile=None, n_tile=None):
    """relu(sum_n linear(x[:, n, :])).   x: (B, N, D_in); w: (D_out, D_in); b: (D_out,)."""
    B, N, D_in = x.shape
    D_out = w.shape[0]
    D_out_pad = _round_up(D_out, 128)
    x_bytes = x.dtype.itemsize
    vmem_limit = _vmem_limit_bytes()

    # Parameter prep (small tensors).  Hoist out of the per-call path when the
    # readout is applied repeatedly with fixed parameters.
    w_t = jnp.transpose(w).astype(x.dtype)                                  # (D_in, D_out)
    # Reference adds bias per node THEN sums over N nodes -> bias contributes N*b.
    b_p = (jnp.pad(b.astype(jnp.float32), (0, D_out_pad - D_out)) * N
           ).reshape(1, D_out_pad)

    K = N * D_in
    folded_w_bytes = 2 * K * D_out_pad * x_bytes                            # double-buffered
    use_folded = (not force_general) and folded_w_bytes <= vmem_limit // 4

    if use_folded:
        # ---- folded path: node axis folded into the MXU contraction --------
        x2 = x.reshape(B, K)                                 # free row-major collapse
        w_rep = jnp.pad(jnp.tile(w_t, (N, 1)),
                        ((0, 0), (0, D_out_pad - D_out)))    # (K, D_out_pad), resident
        budget = vmem_limit - folded_w_bytes - (1 << 20)
        bt = b_tile or _pick_b_tile(B, K * x_bytes, D_out_pad * x_bytes, budget)
        B_pad = _round_up(B, bt)

        out = pl.pallas_call(
            _readout_folded_kernel,
            out_shape=jax.ShapeDtypeStruct((B_pad, D_out_pad), x.dtype),
            grid_spec=pltpu.PrefetchScalarGridSpec(
                num_scalar_prefetch=0,
                grid=(B_pad // bt,),
                in_specs=[
                    pl.BlockSpec((bt, K), lambda i: (i, 0)),
                    pl.BlockSpec((K, D_out_pad), lambda i: (0, 0)),
                    pl.BlockSpec((1, D_out_pad), lambda i: (0, 0)),
                ],
                out_specs=pl.BlockSpec((bt, D_out_pad), lambda i: (i, 0)),
            ),
            compiler_params=pltpu.CompilerParams(
                dimension_semantics=("parallel",),
                vmem_limit_bytes=int(vmem_limit)),
        )(x2, w_rep, b_p)
    else:
        # ---- general path: node-tiled f32 accumulator -----------------------
        w_p = jnp.pad(w_t, ((0, 0), (0, D_out_pad - D_out)))                # (D_in, D_out_pad)
        w_res_bytes = 2 * D_in * D_out_pad * x_bytes
        budget = vmem_limit - w_res_bytes - (1 << 20)
        bt_auto, nt_auto = _pick_tiles_general(B, N, D_in, D_out_pad, x_bytes, budget)
        bt = b_tile or bt_auto
        nt = min(n_tile or nt_auto, N)
        B_pad = _round_up(B, bt)
        n_blocks = _cdiv(N, nt)

        out = pl.pallas_call(
            _make_sum_kernel(N, nt, D_in),
            out_shape=jax.ShapeDtypeStruct((B_pad, D_out_pad), x.dtype),
            grid_spec=pltpu.PrefetchScalarGridSpec(
                num_scalar_prefetch=0,
                grid=(B_pad // bt, n_blocks),
                in_specs=[
                    pl.BlockSpec((bt, nt, D_in), lambda i, k: (i, k, 0)),
                    pl.BlockSpec((D_in, D_out_pad), lambda i, k: (0, 0)),
                    pl.BlockSpec((1, D_out_pad), lambda i, k: (0, 0)),
                ],
                out_specs=pl.BlockSpec((bt, D_out_pad), lambda i, k: (i, 0)),
                scratch_shapes=[pltpu.VMEM((bt, D_out_pad), jnp.float32)],
            ),
            compiler_params=pltpu.CompilerParams(
                dimension_semantics=("parallel", "arbitrary"),
                vmem_limit_bytes=int(vmem_limit)),
        )(x, w_p, b_p)

    # Garbage rows >= B (ragged last batch block) / lanes >= D_out are dropped here.
    return out[:B, :D_out]


def readout_reference(x, w, b):
    # Plain-JAX reference mirroring the PyTorch module exactly.
    h = jnp.einsum("bnd,od->bno", x, w) + b                  # Linear on last dim
    s = jnp.sum(h, axis=1)                                   # .sum(1)
    return jnp.maximum(s, 0.0)                               # F.relu


if __name__ == "__main__":
    key = jax.random.PRNGKey(0)
    kx, kw, kb = jax.random.split(key, 3)

    # ---- case 1: default (folded) path, GCN-readout-like shapes -------------
    B, N, D_in, D_out = 2, 8, 32, 16
    x = jax.random.normal(kx, (B, N, D_in), dtype=jnp.float32)
    w = jax.random.normal(kw, (D_out, D_in), dtype=jnp.float32) * 0.1
    b = jax.random.normal(kb, (D_out,), dtype=jnp.float32) * 0.1

    out = jax.block_until_ready(readout_forward(x, w, b))
    ref = jax.block_until_ready(readout_reference(x, w, b))
    assert out.shape == (B, D_out)
    assert jnp.allclose(out, ref, atol=1e-4, rtol=1e-4), "folded path mismatch"

    # ---- case 2: general (node-tiled accumulator) path, ragged node tile ----
    B2, N2 = 4, 20
    x2 = jax.random.normal(jax.random.fold_in(kx, 1), (B2, N2, D_in), dtype=jnp.float32)
    out2 = jax.block_until_ready(
        readout_forward(x2, w, b, force_general=True, n_tile=8))
    ref2 = jax.block_until_ready(readout_reference(x2, w, b))
    assert out2.shape == (B2, D_out)
    assert jnp.allclose(out2, ref2, atol=1e-4, rtol=1e-4), "general path mismatch"

    print("KERNEL_OK")
</pallas_src>

<mosaic_0001>
module attributes {stable_mosaic.version = 11 : i64} {
  func.func @_readout_folded_kernel(%arg0: i32, %arg1: memref<8x256xf32, #tpu.memory_space<vmem>>, %arg2: memref<256x128xf32, #tpu.memory_space<vmem>>, %arg3: memref<1x128xf32, #tpu.memory_space<vmem>>, %arg4: memref<8x128xf32, #tpu.memory_space<vmem>>) attributes {dimension_semantics = [#tpu.dimension_semantics<parallel>], iteration_bounds = array<i64: 1>, scalar_prefetch = 0 : i64, scratch_operands = 0 : i64, tpu.core_type = #tpu.core_type<tc>, window_params = [{transform_indices = @transform_0, window_bounds = array<i64: 8, 256>}, {pipeline_mode = #tpu.pipeline_mode<synchronous>, transform_indices = @transform_1, window_bounds = array<i64: 256, 128>}, {pipeline_mode = #tpu.pipeline_mode<synchronous>, transform_indices = @transform_2, window_bounds = array<i64: 1, 128>}, {transform_indices = @transform_3, window_bounds = array<i64: 8, 128>}]} {
    %c0 = arith.constant 0 : index
    %c0_0 = arith.constant 0 : index
    %0 = vector.load %arg1[%c0, %c0_0] : memref<8x256xf32, #tpu.memory_space<vmem>>, vector<8x256xf32>
    %c0_1 = arith.constant 0 : index
    %c0_2 = arith.constant 0 : index
    %1 = vector.load %arg2[%c0_1, %c0_2] : memref<256x128xf32, #tpu.memory_space<vmem>>, vector<256x128xf32>
    %cst = arith.constant dense<0.000000e+00> : vector<8x128xf32>
    %2 = tpu.matmul %0, %1, %cst {dimension_numbers = #tpu.dot_dimension_numbers<[1], [0], [0], [1], [0, 0, 1, 1], [], []>} : vector<8x256xf32>, vector<256x128xf32>, vector<8x128xf32> -> vector<8x128xf32>
    %c0_3 = arith.constant 0 : index
    %c0_4 = arith.constant 0 : index
    %3 = vector.load %arg3[%c0_3, %c0_4] : memref<1x128xf32, #tpu.memory_space<vmem>>, vector<1x128xf32>
    %4 = vector.broadcast %3 : vector<1x128xf32> to vector<8x128xf32>
    %5 = arith.addf %2, %4 : vector<8x128xf32>
    %cst_5 = arith.constant 0.000000e+00 : f32
    %6 = vector.broadcast %cst_5 : f32 to vector<8x128xf32>
    %7 = arith.maximumf %5, %6 : vector<8x128xf32>
    %c0_6 = arith.constant 0 : index
    %c0_7 = arith.constant 0 : index
    %8 = vector.load %arg4[%c0_6, %c0_7] : memref<8x128xf32, #tpu.memory_space<vmem>>, vector<8x128xf32>
    tpu.vector_store %arg4[%c0_6, %c0_7], %7 {strides = array<i32>} : memref<8x128xf32, #tpu.memory_space<vmem>>, vector<8x128xf32>,
    return
  }
  func.func @transform_0(%arg0: i32) -> (i32, i32) {
    %c0_i32 = arith.constant 0 : i32
    %c0_i32_0 = arith.constant 0 : i32
    return %arg0, %c0_i32 : i32, i32
  }
  func.func @transform_1(%arg0: i32) -> (i32, i32) {
    %c0_i32 = arith.constant 0 : i32
    %c0_i32_0 = arith.constant 0 : i32
    %c0_i32_1 = arith.constant 0 : i32
    return %c0_i32, %c0_i32_0 : i32, i32
  }
  func.func @transform_2(%arg0: i32) -> (i32, i32) {
    %c0_i32 = arith.constant 0 : i32
    %c0_i32_0 = arith.constant 0 : i32
    %c0_i32_1 = arith.constant 0 : i32
    return %c0_i32, %c0_i32_0 : i32, i32
  }
  func.func @transform_3(%arg0: i32) -> (i32, i32) {
    %c0_i32 = arith.constant 0 : i32
    %c0_i32_0 = arith.constant 0 : i32
    return %arg0, %c0_i32 : i32, i32
  }
}

</mosaic_0001>

<bundles_post_ra>
// kernel: tpu_custom_call.1
= control target key start
LH: loop header
LB: loop body
LE: loop exit
PB: predicated region body
PF: predicated region fallthrough
CT: control target
= control target key end

     0   :  { %8 = vsyncpa [#allocation3], 0  ;;  %s351_s0 = inlined_call_operand.hbm [shape: f32[2,256], index: 0, kind: input, shape index: {}]   ;;  %s352_s1 = inlined_call_operand.hbm [shape: f32[256,128], index: 1, kind: input, shape index: {}]   ;;  %s353_s2 = inlined_call_operand.vmem [shape: f32[1,128], index: 2, kind: input, shape index: {}]   ;;  %s354_s3 = inlined_call_operand.hbm [shape: f32[8,128], index: 3, kind: output, shape index: {}]  }
   0x1   :  { %9 = vsyncpa [#allocation6], 0 }
   0x2   :  { %10 = vsyncpa [#allocation4], 0 }
   0x3   :  { %15 = vsyncadd [#allocation3], 192  ;;  %s312_s12 = smov [#allocation2]  }
   0x4   :  { %s16_s13 = sshll.u32 %s312_s12, 4  ;;  %s17_s13 = int_to_ptr.vmem [resolvable:$true] %s16_s13 }
   0x5   :  { %s254_s14 = scalar_lea.vmem %s17_s13, 64  ;;  %s258_s15 = scalar_lea.vmem %s17_s13, 256 }
   0x6   :  { %p255_p0 = scmp.ne.s32.totalorder %s17_s13, %s254_s14  ;;  %p259_p1 = scmp.lt.s32.totalorder %s17_s13, %s17_s13 }
   0x7   :  { %p260_p2 = scmp.lt.s32.totalorder %s258_s15, %s254_s14 }
   0x9   :  { %p261_p3 = por %p260_p2, %p259_p1 }
   0xb   :  { %p262_p4 = pnand %p261_p3, %p255_p0 }
   0xd   :  { %265 = shalt.err (!%p262_p4)
}
   0xe   :  { %s313_s16 = smov 64   ;;  %s314_s17 = smov 4  }
   0xf   :  { %22 = dma.hbm_to_vmem [thread:$0]  %s351_s0, 64, %s17_s13, [#allocation3], %s313_s16, %s313_s16, %s314_s17  }
  0x10   :  { %s315_s20 = smov [#allocation5]  }
  0x11   :  { %s28_s21 = sshll.u32 %s315_s20, 4  ;;  %s29_s21 = int_to_ptr.vmem [resolvable:$true] %s28_s21 }
  0x12   :  { %s274_s22 = scalar_lea.vmem %s29_s21, 4096  ;;  %p279_p6 = scmp.lt.s32.totalorder %s29_s21, %s29_s21 }
  0x13   :  { %p275_p5 = scmp.ne.s32.totalorder %s29_s21, %s274_s22  ;;  %p280_p7 = scmp.lt.s32.totalorder %s274_s22, %s274_s22 }
  0x15   :  { %p281_p8 = por %p280_p7, %p279_p6 }
  0x17   :  { %p282_p9 = pnand %p281_p8, %p275_p5 }
  0x19   :  { %285 = shalt.err (!%p282_p9)
}
  0x1a   :  { %s316_s23 = smov 128   ;;  %s317_s24 = smov 8  }
  0x1b   :  { %34 = dma.hbm_to_vmem [thread:$0]  %s352_s1, 4096, %s29_s21, [#allocation6], %s316_s23, %s316_s23, %s317_s24  }
  0x1c   :  { %306 = dma.done.wait [#allocation3], 256  }
  0x1d   :  { %307 = vsyncadd [#allocation3], 4294967040 }
  0x1e   :  { %308 = dma.done.wait [#allocation6], 4096  }
  0x1f   :  { %309 = vsyncadd [#allocation6], 4294963200  ;;  %v78_v0 = vld [vmem:[#allocation5 + $0xf8] sm:$0xff]  ;;  %v77_v2 = vld [vmem:[#allocation5 + $0xf0] sm:$0xff]  ;;  %s318_s27 = smov [#allocation7]  }
  0x20   :  { %v62_v1 = vld [vmem:[#allocation5 + $0x78] sm:$0xff]  ;;  %199 = vmatprep.subr.mxu0 %v78_v0  ;;  %v61_v3 = vld [vmem:[#allocation5 + $0x70] sm:$0xff]  ;;  %v76_v4 = vld [vmem:[#allocation5 + $0xe8] sm:$0xff]  ;;  %s188_s28 = sshll.u32 %s318_s27, 4  ;;  %s189_s28 = int_to_ptr.vmem [resolvable:$true] %s188_s28 }
  0x21   :  { %200 = vmatpush3.msra.mxu0 %v62_v1  ;;  %v60_v5 = vld [vmem:[#allocation5 + $0x68] sm:$0xff]  ;;  %v75_v6 = vld [vmem:[#allocation5 + $0xe0] sm:$0xff]  ;;  %v74_v8 = vld [vmem:[#allocation5 + $0xd8] sm:$0xff]  ;;  %s286_s29 = scalar_lea.vmem %s189_s28, 128  ;;  %p291_p11 = scmp.lt.s32.totalorder %s189_s28, %s189_s28 }
  0x22   :  { %201 = vmatprep.subr.mxu0 %v77_v2  ;;  %v59_v7 = vld [vmem:[#allocation5 + $0x60] sm:$0xff]  ;;  %v58_v9 = vld [vmem:[#allocation5 + $0x58] sm:$0xff]  ;;  %v73_v10 = vld [vmem:[#allocation5 + $0xd0] sm:$0xff]  ;;  %p287_p10 = scmp.ne.s32.totalorder %s189_s28, %s286_s29  ;;  %p292_p12 = scmp.lt.s32.totalorder %s286_s29, %s286_s29 }
  0x23   :  { %202 = vmatpush3.msra.mxu0 %v61_v3  ;;  %v57_v11 = vld [vmem:[#allocation5 + $0x50] sm:$0xff]  ;;  %v72_v12 = vld [vmem:[#allocation5 + $0xc8] sm:$0xff]  ;;  %v71_v14 = vld [vmem:[#allocation5 + $0xc0] sm:$0xff] }
  0x24   :  { %203 = vmatprep.subr.mxu0 %v76_v4  ;;  %v56_v13 = vld [vmem:[#allocation5 + $0x48] sm:$0xff]  ;;  %v244_v15 = vld.sshfl [vmem:[#allocation2] sm:$0xff pattern:$0x76325410]  ;;  %v55_v17 = vld [vmem:[#allocation5 + $0x40] sm:$0xff]  ;;  %p293_p13 = por %p292_p12, %p291_p11 }
  0x25   :  { %204 = vmatpush3.msra.mxu0 %v60_v5  ;;  %v245_v16 = vld.sshfl [vmem:[#allocation2 + $0x8] sm:$0xff pattern:$0x76325410]  ;;  %v69_v20 = vld [vmem:[#allocation5 + $0xb0] sm:$0xff]  ;;  %v68_v23 = vld [vmem:[#allocation5 + $0xa8] sm:$0xff] }
  0x26   :  { %205 = vmatprep.subr.mxu0 %v75_v6  ;;  %v70_v18 = vld [vmem:[#allocation5 + $0xb8] sm:$0xff]  ;;  %v107_v21 = vcombine.high %v244_v15, %v245_v16  ;;  %v53_v22 = vld [vmem:[#allocation5 + $0x30] sm:$0xff]  ;;  %v52_v24 = vld [vmem:[#allocation5 + $0x28] sm:$0xff]  ;;  %v106_v35 = vcombine.low %v244_v15, %v245_v16  ;;  %p294_p0 = pnand %p293_p13, %p287_p10 }
  0x27   :  { %206 = vmatpush3.msra.mxu0 %v59_v7  ;;  %v54_v19 = vld [vmem:[#allocation5 + $0x38] sm:$0xff]  ;;  %v67_v25 = vld [vmem:[#allocation5 + $0xa0] sm:$0xff]  ;;  %v65_v29 = vld [vmem:[#allocation5 + $0x90] sm:$0xff] }
  0x28   :  { %207 = vmatprep.subr.mxu0 %v74_v8  ;;  %174 = vmatprep.mubr.f32.mxu0 %v107_v21  ;;  %v51_v26 = vld [vmem:[#allocation5 + $0x20] sm:$0xff]  ;;  %v66_v27 = vld [vmem:[#allocation5 + $0x98] sm:$0xff]  ;;  %v49_v30 = vld [vmem:[#allocation5 + $0x10] sm:$0xff] }
  0x29   :  { %208 = vmatpush3.msra.mxu0 %v58_v9  ;;  %v50_v28 = vld [vmem:[#allocation5 + $0x18] sm:$0xff]  ;;  %v64_v31 = vld [vmem:[#allocation5 + $0x88] sm:$0xff]  ;;  %v63_v33 = vld [vmem:[#allocation5 + $0x80] sm:$0xff] }
  0x2a   :  { %209 = vmatprep.subr.mxu0 %v73_v10  ;;  %v48_v32 = vld [vmem:[#allocation5 + $0x8] sm:$0xff]  ;;  %v47_v34 = vld [vmem:[#allocation5] sm:$0xff]  ;;  %v198_v37 = vld [vmem:[%s353_s2] ss:$0 sm:$0xff] }
  0x2b   :  { %210 = vmatpush3.msra.mxu0 %v57_v11 }
  0x2c   :  { %211 = vmatprep.subr.mxu0 %v72_v12 }
  0x2d   :  { %212 = vmatpush3.msra.mxu0 %v56_v13 }
  0x2e   :  { %213 = vmatprep.subr.mxu0 %v71_v14 }
  0x2f   :  { %214 = vmatpush3.msra.mxu0 %v55_v17 }
  0x30   :  { %215 = vmatprep.subr.mxu0 %v70_v18 }
  0x31   :  { %216 = vmatpush3.msra.mxu0 %v54_v19 }
  0x32   :  { %217 = vmatprep.subr.mxu0 %v69_v20 }
  0x33   :  { %218 = vmatpush3.msra.mxu0 %v53_v22 }
  0x34   :  { %219 = vmatprep.subr.mxu0 %v68_v23 }
  0x35   :  { %220 = vmatpush3.msra.mxu0 %v52_v24 }
  0x36   :  { %221 = vmatprep.subr.mxu0 %v67_v25 }
  0x37   :  { %222 = vmatpush3.msra.mxu0 %v51_v26 }
  0x38   :  { %223 = vmatprep.subr.mxu0 %v66_v27 }
  0x39   :  { %224 = vmatpush3.msra.mxu0 %v50_v28 }
  0x3a   :  { %225 = vmatprep.subr.mxu0 %v65_v29 }
  0x3b   :  { %226 = vmatpush3.msra.mxu0 %v49_v30 }
  0x3c   :  { %227 = vmatprep.subr.mxu0 %v64_v31 }
  0x3d   :  { %228 = vmatpush3.msra.mxu0 %v48_v32 }
  0x3e   :  { %229 = vmatprep.subr.mxu0 %v63_v33 }
  0x3f   :  { %230 = vmatpush3.msra.mxu0 %v47_v34 }
  0x40   :  { %175 = vmatmul.mubr.f32.vlgmr.msra.gmra.mxu0 %v106_v35 }
 0x100   :  { %v231_v36 = vpop.f32.mrf.mxu0 }
 0x102   :  { %v232_v38 = vpop.f32.mrf.mxu0 }
 0x103   :  { %v233_v39 = vadd.f32 %v232_v38, %v231_v36 }
 0x105   :  { %v177_v40 = vadd.f32 %v233_v39, %v198_v37 }
 0x107   :  { %v180_v41 = vmax.f32 %v177_v40, 0.0 }
 0x109   :  { %181 = vst [vmem:[#allocation7] sm:$0xff] %v180_v41 }
 0x10a   :  { %297 = shalt.err (!%p294_p0)
}
 0x10b   :  { %191 = dma.vmem_to_hbm [thread:$0]  %s189_s28, 128, %s354_s3, [#allocation4]  }
 0x10c   :  { %310 = dma.done.wait [#allocation4], 128  }
 0x10d   :  { %311 = vsyncadd [#allocation4], 4294967168 }
 0x10e   :  { %195 = vsyncpa [#allocation3], 1 }
 0x10f   :  { %196 = vsyncpa [#allocation6], 1 }
 0x110   :  { %197 = vsyncpa [#allocation4], 1 }

</bundles_post_ra>
